<compile_context>
chip_gen: v7x
topology: tpu7x:2x2x1
jax: 0.10.0
libtpu: 0.0.40
codegen_flags: <defaults>
</compile_context>

<pallas_src>
import jax
import jax.numpy as jnp
from jax.experimental import pallas as pl
from jax.experimental.pallas import tpu as pltpu

EPS = 1e-5


# ----------------------------------------------------------------------------
# kernels
# ----------------------------------------------------------------------------
def _shifted_cat(x):
    """x: (L, C) -> (L, 3C) = [x[t-1] | x[t] | x[t+1]] with zero boundaries."""
    l = x.shape[0]
    row = jax.lax.broadcasted_iota(jnp.int32, x.shape, 0)
    xm1 = jnp.where(row == 0, 0.0, pltpu.roll(x, shift=1, axis=0))
    xp1 = jnp.where(row == l - 1, 0.0, pltpu.roll(x, shift=l - 1, axis=0))
    return jnp.concatenate([xm1, x, xp1], axis=1)


def _pool_conv1_kernel(xg_ref, w1_ref, h1_ref, st_ref):
    # xg_ref: (1, L2, 2*Cin) -- adjacent pooling pairs sit side-by-side on lanes.
    xg = xg_ref[0]
    cin = xg.shape[1] // 2
    xp = jnp.maximum(xg[:, :cin], xg[:, cin:])               # MaxPool1d(2): (L2, Cin)
    xc = _shifted_cat(xp)                                    # (L2, 3*Cin)
    h = jnp.dot(xc, w1_ref[...], preferred_element_type=jnp.float32)   # (L2, Cmid)
    h1_ref[0] = h.astype(h1_ref.dtype)
    s = jnp.sum(h, axis=0, keepdims=True)                    # (1, Cmid)
    ss = jnp.sum(h * h, axis=0, keepdims=True)               # (1, Cmid)
    st_ref[0] = jnp.concatenate([s, ss], axis=0)             # (2, Cmid)


def _bn1_conv2_kernel(h1_ref, s1_ref, b1_ref, w2_ref, h2_ref, st_ref):
    h1 = h1_ref[0]                                           # (L2, Cmid)
    a = jnp.maximum(h1 * s1_ref[...] + b1_ref[...], 0.0)     # BN1 affine + ReLU
    ac = _shifted_cat(a)                                     # (L2, 3*Cmid)
    h = jnp.dot(ac, w2_ref[...], preferred_element_type=jnp.float32)   # (L2, Cout)
    h2_ref[0] = h.astype(h2_ref.dtype)
    s = jnp.sum(h, axis=0, keepdims=True)
    ss = jnp.sum(h * h, axis=0, keepdims=True)
    st_ref[0] = jnp.concatenate([s, ss], axis=0)             # (2, Cout)


def _bn2_out_kernel(h2_ref, s2_ref, b2_ref, o_ref):
    y = jnp.maximum(h2_ref[0] * s2_ref[...] + b2_ref[...], 0.0)   # (L2, Cout)
    o_ref[0] = jnp.transpose(y).astype(o_ref.dtype)               # NCL: (Cout, L2)


# ----------------------------------------------------------------------------
# wrapper
# ----------------------------------------------------------------------------
def _tile_spec(shape):
    """Block = one batch element, full trailing dims."""
    nd = len(shape)
    return pl.BlockSpec((1,) + tuple(shape[1:]),
                        lambda i, _nd=nd: (i,) + (0,) * (_nd - 1))


def _rep_spec(shape):
    """Whole array resident for every grid step (weights / per-channel params)."""
    nd = len(shape)
    return pl.BlockSpec(tuple(shape), lambda i, _nd=nd: (0,) * _nd)


def _scale_bias(st, count, gamma, beta):
    """Combine per-tile partial stats -> BN affine scale/bias (biased var, eps)."""
    tot = jnp.sum(st, axis=0)                 # (2, C)
    mean = tot[0] / count
    var = tot[1] / count - mean * mean        # biased variance (train-mode BN)
    scale = gamma * jax.lax.rsqrt(var + EPS)
    bias = beta - mean * scale
    return scale.reshape(1, -1), bias.reshape(1, -1)


def down_forward(x_ncl, params):
    """x_ncl: (N, Cin, L) float32 -> (N, Cout, L//2) float32 (PyTorch Down, train-mode BN)."""
    w1, g1, b1, w2, g2, b2 = params
    n, cin, l = x_ncl.shape
    cmid = w1.shape[0]
    cout = w2.shape[0]
    l2 = l // 2
    f32 = jnp.float32

    # NCL -> NLC once (interface is PyTorch NCL; pass NLC upstream to skip this),
    # then a free metadata reshape putting each pool pair side-by-side on lanes.
    x_nlc = jnp.transpose(x_ncl, (0, 2, 1)).astype(f32)
    xg = x_nlc[:, : 2 * l2, :].reshape(n, l2, 2 * cin)

    # PyTorch conv weights (O, I, K) -> fused per-tap matrices (3*I, O), tap-major rows.
    w1f = jnp.transpose(w1, (2, 1, 0)).reshape(3 * cin, cmid).astype(f32)
    w2f = jnp.transpose(w2, (2, 1, 0)).reshape(3 * cmid, cout).astype(f32)

    cparams = pltpu.CompilerParams(
        dimension_semantics=("parallel",),          # shard batch grid over TCs (v7x)
        vmem_limit_bytes=32 * 1024 * 1024,          # explicit, safe on v5e/v6e/v7x
    )

    # Pass 1: maxpool + conv1 + partial BN stats.
    h1, st1 = pl.pallas_call(
        _pool_conv1_kernel,
        grid=(n,),
        in_specs=[_tile_spec((n, l2, 2 * cin)), _rep_spec((3 * cin, cmid))],
        out_specs=(_tile_spec((n, l2, cmid)), _tile_spec((n, 2, cmid))),
        out_shape=(jax.ShapeDtypeStruct((n, l2, cmid), f32),
                   jax.ShapeDtypeStruct((n, 2, cmid), f32)),
        compiler_params=cparams,
    )(xg, w1f)
    s1, t1 = _scale_bias(st1, n * l2, g1.astype(f32), b1.astype(f32))

    # Pass 2: BN1 + ReLU + conv2 + partial BN stats.
    h2, st2 = pl.pallas_call(
        _bn1_conv2_kernel,
        grid=(n,),
        in_specs=[_tile_spec((n, l2, cmid)), _rep_spec((1, cmid)),
                  _rep_spec((1, cmid)), _rep_spec((3 * cmid, cout))],
        out_specs=(_tile_spec((n, l2, cout)), _tile_spec((n, 2, cout))),
        out_shape=(jax.ShapeDtypeStruct((n, l2, cout), f32),
                   jax.ShapeDtypeStruct((n, 2, cout), f32)),
        compiler_params=cparams,
    )(h1, s1, t1, w2f)
    s2, t2 = _scale_bias(st2, n * l2, g2.astype(f32), b2.astype(f32))

    # Pass 3: BN2 + ReLU, written directly in NCL (lane-dense along L).
    out = pl.pallas_call(
        _bn2_out_kernel,
        grid=(n,),
        in_specs=[_tile_spec((n, l2, cout)), _rep_spec((1, cout)),
                  _rep_spec((1, cout))],
        out_specs=_tile_spec((n, cout, l2)),
        out_shape=jax.ShapeDtypeStruct((n, cout, l2), f32),
        compiler_params=cparams,
    )(h2, s2, t2)
    return out


# ----------------------------------------------------------------------------
# pure-JAX reference (matches PyTorch Down.forward, training-mode BN)
# ----------------------------------------------------------------------------
def down_reference(x_ncl, params):
    w1, g1, b1, w2, g2, b2 = params
    xp = jax.lax.reduce_window(
        x_ncl, -jnp.inf, jax.lax.max,
        window_dimensions=(1, 1, 2), window_strides=(1, 1, 2), padding="VALID")

    def conv(h, w):
        return jax.lax.conv_general_dilated(
            h, w, window_strides=(1,), padding=[(1, 1)],
            dimension_numbers=("NCH", "OIH", "NCH"))

    def bn_relu(h, g, b):
        mean = jnp.mean(h, axis=(0, 2), keepdims=True)
        var = jnp.mean((h - mean) ** 2, axis=(0, 2), keepdims=True)
        h = (h - mean) * jax.lax.rsqrt(var + EPS)
        h = h * g.reshape(1, -1, 1) + b.reshape(1, -1, 1)
        return jnp.maximum(h, 0.0)

    h = bn_relu(conv(xp, w1), g1, b1)
    h = bn_relu(conv(h, w2), g2, b2)
    return h


if __name__ == "__main__":
    key = jax.random.PRNGKey(0)
    N, Cin, L = 2, 4, 16
    Cout = 8
    Cmid = Cout

    k = jax.random.split(key, 7)
    x = jax.random.normal(k[0], (N, Cin, L), jnp.float32)
    w1 = jax.random.normal(k[1], (Cmid, Cin, 3), jnp.float32) / jnp.sqrt(3.0 * Cin)
    g1 = 1.0 + 0.1 * jax.random.normal(k[2], (Cmid,), jnp.float32)
    b1 = 0.1 * jax.random.normal(k[3], (Cmid,), jnp.float32)
    w2 = jax.random.normal(k[4], (Cout, Cmid, 3), jnp.float32) / jnp.sqrt(3.0 * Cmid)
    g2 = 1.0 + 0.1 * jax.random.normal(k[5], (Cout,), jnp.float32)
    b2 = 0.1 * jax.random.normal(k[6], (Cout,), jnp.float32)
    params = (w1, g1, b1, w2, g2, b2)

    out = jax.block_until_ready(jax.jit(down_forward)(x, params))
    ref = jax.block_until_ready(down_reference(x, params))

    assert out.shape == (N, Cout, L // 2), out.shape
    err = float(jnp.max(jnp.abs(out - ref)))
    if err > 1e-4:
        raise AssertionError(f"mismatch vs reference: max abs err = {err:e}")
    print("KERNEL_OK")
</pallas_src>

<mosaic_0001>
module attributes {stable_mosaic.version = 11 : i64} {
  func.func @_pool_conv1_kernel(%arg0: i32, %arg1: memref<1x8x8xf32, #tpu.memory_space<vmem>>, %arg2: memref<12x8xf32, #tpu.memory_space<vmem>>, %arg3: memref<1x8x8xf32, #tpu.memory_space<vmem>>, %arg4: memref<1x2x8xf32, #tpu.memory_space<vmem>>) attributes {dimension_semantics = [#tpu.dimension_semantics<parallel>], iteration_bounds = array<i64: 2>, scalar_prefetch = 0 : i64, scratch_operands = 0 : i64, tpu.core_type = #tpu.core_type<tc>, window_params = [{transform_indices = @transform_0, window_bounds = array<i64: 1, 8, 8>}, {pipeline_mode = #tpu.pipeline_mode<synchronous>, transform_indices = @transform_1, window_bounds = array<i64: 12, 8>}, {transform_indices = @transform_2, window_bounds = array<i64: 1, 8, 8>}, {transform_indices = @transform_3, window_bounds = array<i64: 1, 2, 8>}]} {
    %c0 = arith.constant 0 : index
    %c0_0 = arith.constant 0 : index
    %c0_1 = arith.constant 0 : index
    %0 = vector.load %arg1[%c0, %c0_0, %c0_1] : memref<1x8x8xf32, #tpu.memory_space<vmem>>, vector<1x8x8xf32>
    %1 = vector.shape_cast %0 : vector<1x8x8xf32> to vector<8x8xf32>
    %2 = vector.extract_strided_slice %1 {offsets = [0, 0], sizes = [8, 4], strides = [1, 1]} : vector<8x8xf32> to vector<8x4xf32>
    %3 = vector.extract_strided_slice %1 {offsets = [0, 4], sizes = [8, 4], strides = [1, 1]} : vector<8x8xf32> to vector<8x4xf32>
    %4 = arith.maximumf %2, %3 : vector<8x4xf32>
    %5 = tpu.iota {dimensions = array<i32: 0>} : vector<8x4xi32>
    %c0_i32 = arith.constant 0 : i32
    %6 = vector.broadcast %c0_i32 : i32 to vector<8x4xi32>
    %7 = arith.cmpi eq, %5, %6 : vector<8x4xi32>
    %c1_i32 = arith.constant 1 : i32
    %8 = tpu.dynamic_rotate %4 by %c1_i32 dim 0 : vector<8x4xf32>, i32 -> vector<8x4xf32>
    %cst = arith.constant 0.000000e+00 : f32
    %9 = vector.broadcast %cst : f32 to vector<8x4xf32>
    %10 = arith.select %7, %9, %8 : vector<8x4xi1>, vector<8x4xf32>
    %c7_i32 = arith.constant 7 : i32
    %11 = vector.broadcast %c7_i32 : i32 to vector<8x4xi32>
    %12 = arith.cmpi eq, %5, %11 : vector<8x4xi32>
    %c7_i32_2 = arith.constant 7 : i32
    %13 = tpu.dynamic_rotate %4 by %c7_i32_2 dim 0 : vector<8x4xf32>, i32 -> vector<8x4xf32>
    %cst_3 = arith.constant 0.000000e+00 : f32
    %14 = vector.broadcast %cst_3 : f32 to vector<8x4xf32>
    %15 = arith.select %12, %14, %13 : vector<8x4xi1>, vector<8x4xf32>
    %16 = tpu.concatenate %10, %4, %15 in 1 : vector<8x4xf32>, vector<8x4xf32>, vector<8x4xf32> -> vector<8x12xf32>
    %c0_4 = arith.constant 0 : index
    %c0_5 = arith.constant 0 : index
    %17 = vector.load %arg2[%c0_4, %c0_5] : memref<12x8xf32, #tpu.memory_space<vmem>>, vector<12x8xf32>
    %cst_6 = arith.constant dense<0.000000e+00> : vector<8x8xf32>
    %18 = tpu.matmul %16, %17, %cst_6 {dimension_numbers = #tpu.dot_dimension_numbers<[1], [0], [0], [1], [0, 0, 1, 1], [], []>} : vector<8x12xf32>, vector<12x8xf32>, vector<8x8xf32> -> vector<8x8xf32>
    %c0_7 = arith.constant 0 : index
    %c0_8 = arith.constant 0 : index
    %c0_9 = arith.constant 0 : index
    %19 = vector.load %arg3[%c0_7, %c0_8, %c0_9] : memref<1x8x8xf32, #tpu.memory_space<vmem>>, vector<1x8x8xf32>
    %20 = vector.shape_cast %19 : vector<1x8x8xf32> to vector<8x8xf32>
    %21 = vector.shape_cast %18 : vector<8x8xf32> to vector<1x8x8xf32>
    tpu.vector_store %arg3[%c0_7, %c0_8, %c0_9], %21 {strides = array<i32>} : memref<1x8x8xf32, #tpu.memory_space<vmem>>, vector<1x8x8xf32>,
    %cst_10 = arith.constant dense<0.000000e+00> : vector<8xf32>
    %22 = vector.multi_reduction <add>, %18, %cst_10 [0] : vector<8x8xf32> to vector<8xf32>
    %23 = vector.shape_cast %22 : vector<8xf32> to vector<1x8xf32>
    %24 = arith.mulf %18, %18 : vector<8x8xf32>
    %cst_11 = arith.constant dense<0.000000e+00> : vector<8xf32>
    %25 = vector.multi_reduction <add>, %24, %cst_11 [0] : vector<8x8xf32> to vector<8xf32>
    %26 = vector.shape_cast %25 : vector<8xf32> to vector<1x8xf32>
    %27 = tpu.concatenate %23, %26 in 0 : vector<1x8xf32>, vector<1x8xf32> -> vector<2x8xf32>
    %c0_12 = arith.constant 0 : index
    %c0_13 = arith.constant 0 : index
    %c0_14 = arith.constant 0 : index
    %28 = vector.load %arg4[%c0_12, %c0_13, %c0_14] : memref<1x2x8xf32, #tpu.memory_space<vmem>>, vector<1x2x8xf32>
    %29 = vector.shape_cast %28 : vector<1x2x8xf32> to vector<2x8xf32>
    %30 = vector.shape_cast %27 : vector<2x8xf32> to vector<1x2x8xf32>
    tpu.vector_store %arg4[%c0_12, %c0_13, %c0_14], %30 {strides = array<i32>} : memref<1x2x8xf32, #tpu.memory_space<vmem>>, vector<1x2x8xf32>,
    return
  }
  func.func @transform_0(%arg0: i32) -> (i32, i32, i32) {
    %c0_i32 = arith.constant 0 : i32
    %c0_i32_0 = arith.constant 0 : i32
    %c0_i32_1 = arith.constant 0 : i32
    return %arg0, %c0_i32, %c0_i32_0 : i32, i32, i32
  }
  func.func @transform_1(%arg0: i32) -> (i32, i32) {
    %c0_i32 = arith.constant 0 : i32
    %c0_i32_0 = arith.constant 0 : i32
    %c0_i32_1 = arith.constant 0 : i32
    return %c0_i32, %c0_i32_0 : i32, i32
  }
  func.func @transform_2(%arg0: i32) -> (i32, i32, i32) {
    %c0_i32 = arith.constant 0 : i32
    %c0_i32_0 = arith.constant 0 : i32
    %c0_i32_1 = arith.constant 0 : i32
    return %arg0, %c0_i32, %c0_i32_0 : i32, i32, i32
  }
  func.func @transform_3(%arg0: i32) -> (i32, i32, i32) {
    %c0_i32 = arith.constant 0 : i32
    %c0_i32_0 = arith.constant 0 : i32
    %c0_i32_1 = arith.constant 0 : i32
    return %arg0, %c0_i32, %c0_i32_0 : i32, i32, i32
  }
}

module attributes {stable_mosaic.version = 11 : i64} {
  func.func @_bn2_out_kernel(%arg0: i32, %arg1: memref<1x8x8xf32, #tpu.memory_space<vmem>>, %arg2: memref<1x8xf32, #tpu.memory_space<vmem>>, %arg3: memref<1x8xf32, #tpu.memory_space<vmem>>, %arg4: memref<1x8x8xf32, #tpu.memory_space<vmem>>) attributes {dimension_semantics = [#tpu.dimension_semantics<parallel>], iteration_bounds = array<i64: 2>, scalar_prefetch = 0 : i64, scratch_operands = 0 : i64, tpu.core_type = #tpu.core_type<tc>, window_params = [{transform_indices = @transform_0, window_bounds = array<i64: 1, 8, 8>}, {pipeline_mode = #tpu.pipeline_mode<synchronous>, transform_indices = @transform_1, window_bounds = array<i64: 1, 8>}, {pipeline_mode = #tpu.pipeline_mode<synchronous>, transform_indices = @transform_2, window_bounds = array<i64: 1, 8>}, {transform_indices = @transform_3, window_bounds = array<i64: 1, 8, 8>}]} {
    %c0 = arith.constant 0 : index
    %c0_0 = arith.constant 0 : index
    %c0_1 = arith.constant 0 : index
    %0 = vector.load %arg1[%c0, %c0_0, %c0_1] : memref<1x8x8xf32, #tpu.memory_space<vmem>>, vector<1x8x8xf32>
    %1 = vector.shape_cast %0 : vector<1x8x8xf32> to vector<8x8xf32>
    %c0_2 = arith.constant 0 : index
    %c0_3 = arith.constant 0 : index
    %2 = vector.load %arg2[%c0_2, %c0_3] : memref<1x8xf32, #tpu.memory_space<vmem>>, vector<1x8xf32>
    %3 = vector.broadcast %2 : vector<1x8xf32> to vector<8x8xf32>
    %4 = arith.mulf %1, %3 : vector<8x8xf32>
    %c0_4 = arith.constant 0 : index
    %c0_5 = arith.constant 0 : index
    %5 = vector.load %arg3[%c0_4, %c0_5] : memref<1x8xf32, #tpu.memory_space<vmem>>, vector<1x8xf32>
    %6 = vector.broadcast %5 : vector<1x8xf32> to vector<8x8xf32>
    %7 = arith.addf %4, %6 : vector<8x8xf32>
    %cst = arith.constant 0.000000e+00 : f32
    %8 = vector.broadcast %cst : f32 to vector<8x8xf32>
    %9 = arith.maximumf %7, %8 : vector<8x8xf32>
    %10 = tpu.transpose %9, [1, 0] : vector<8x8xf32> -> vector<8x8xf32>
    %c0_6 = arith.constant 0 : index
    %c0_7 = arith.constant 0 : index
    %c0_8 = arith.constant 0 : index
    %11 = vector.load %arg4[%c0_6, %c0_7, %c0_8] : memref<1x8x8xf32, #tpu.memory_space<vmem>>, vector<1x8x8xf32>
    %12 = vector.shape_cast %11 : vector<1x8x8xf32> to vector<8x8xf32>
    %13 = vector.shape_cast %10 : vector<8x8xf32> to vector<1x8x8xf32>
    tpu.vector_store %arg4[%c0_6, %c0_7, %c0_8], %13 {strides = array<i32>} : memref<1x8x8xf32, #tpu.memory_space<vmem>>, vector<1x8x8xf32>,
    return
  }
  func.func @transform_0(%arg0: i32) -> (i32, i32, i32) {
    %c0_i32 = arith.constant 0 : i32
    %c0_i32_0 = arith.constant 0 : i32
    %c0_i32_1 = arith.constant 0 : i32
    return %arg0, %c0_i32, %c0_i32_0 : i32, i32, i32
  }
  func.func @transform_1(%arg0: i32) -> (i32, i32) {
    %c0_i32 = arith.constant 0 : i32
    %c0_i32_0 = arith.constant 0 : i32
    %c0_i32_1 = arith.constant 0 : i32
    return %c0_i32, %c0_i32_0 : i32, i32
  }
  func.func @transform_2(%arg0: i32) -> (i32, i32) {
    %c0_i32 = arith.constant 0 : i32
    %c0_i32_0 = arith.constant 0 : i32
    %c0_i32_1 = arith.constant 0 : i32
    return %c0_i32, %c0_i32_0 : i32, i32
  }
  func.func @transform_3(%arg0: i32) -> (i32, i32, i32) {
    %c0_i32 = arith.constant 0 : i32
    %c0_i32_0 = arith.constant 0 : i32
    %c0_i32_1 = arith.constant 0 : i32
    return %arg0, %c0_i32, %c0_i32_0 : i32, i32, i32
  }
}

module attributes {stable_mosaic.version = 11 : i64} {
  func.func @_bn1_conv2_kernel(%arg0: i32, %arg1: memref<1x8x8xf32, #tpu.memory_space<vmem>>, %arg2: memref<1x8xf32, #tpu.memory_space<vmem>>, %arg3: memref<1x8xf32, #tpu.memory_space<vmem>>, %arg4: memref<24x8xf32, #tpu.memory_space<vmem>>, %arg5: memref<1x8x8xf32, #tpu.memory_space<vmem>>, %arg6: memref<1x2x8xf32, #tpu.memory_space<vmem>>) attributes {dimension_semantics = [#tpu.dimension_semantics<parallel>], iteration_bounds = array<i64: 2>, scalar_prefetch = 0 : i64, scratch_operands = 0 : i64, tpu.core_type = #tpu.core_type<tc>, window_params = [{transform_indices = @transform_0, window_bounds = array<i64: 1, 8, 8>}, {pipeline_mode = #tpu.pipeline_mode<synchronous>, transform_indices = @transform_1, window_bounds = array<i64: 1, 8>}, {pipeline_mode = #tpu.pipeline_mode<synchronous>, transform_indices = @transform_2, window_bounds = array<i64: 1, 8>}, {pipeline_mode = #tpu.pipeline_mode<synchronous>, transform_indices = @transform_3, window_bounds = array<i64: 24, 8>}, {transform_indices = @transform_4, window_bounds = array<i64: 1, 8, 8>}, {transform_indices = @transform_5, window_bounds = array<i64: 1, 2, 8>}]} {
    %c0 = arith.constant 0 : index
    %c0_0 = arith.constant 0 : index
    %c0_1 = arith.constant 0 : index
    %0 = vector.load %arg1[%c0, %c0_0, %c0_1] : memref<1x8x8xf32, #tpu.memory_space<vmem>>, vector<1x8x8xf32>
    %1 = vector.shape_cast %0 : vector<1x8x8xf32> to vector<8x8xf32>
    %c0_2 = arith.constant 0 : index
    %c0_3 = arith.constant 0 : index
    %2 = vector.load %arg2[%c0_2, %c0_3] : memref<1x8xf32, #tpu.memory_space<vmem>>, vector<1x8xf32>
    %3 = vector.broadcast %2 : vector<1x8xf32> to vector<8x8xf32>
    %4 = arith.mulf %1, %3 : vector<8x8xf32>
    %c0_4 = arith.constant 0 : index
    %c0_5 = arith.constant 0 : index
    %5 = vector.load %arg3[%c0_4, %c0_5] : memref<1x8xf32, #tpu.memory_space<vmem>>, vector<1x8xf32>
    %6 = vector.broadcast %5 : vector<1x8xf32> to vector<8x8xf32>
    %7 = arith.addf %4, %6 : vector<8x8xf32>
    %cst = arith.constant 0.000000e+00 : f32
    %8 = vector.broadcast %cst : f32 to vector<8x8xf32>
    %9 = arith.maximumf %7, %8 : vector<8x8xf32>
    %10 = tpu.iota {dimensions = array<i32: 0>} : vector<8x8xi32>
    %c0_i32 = arith.constant 0 : i32
    %11 = vector.broadcast %c0_i32 : i32 to vector<8x8xi32>
    %12 = arith.cmpi eq, %10, %11 : vector<8x8xi32>
    %c1_i32 = arith.constant 1 : i32
    %13 = tpu.dynamic_rotate %9 by %c1_i32 dim 0 : vector<8x8xf32>, i32 -> vector<8x8xf32>
    %cst_6 = arith.constant 0.000000e+00 : f32
    %14 = vector.broadcast %cst_6 : f32 to vector<8x8xf32>
    %15 = arith.select %12, %14, %13 : vector<8x8xi1>, vector<8x8xf32>
    %c7_i32 = arith.constant 7 : i32
    %16 = vector.broadcast %c7_i32 : i32 to vector<8x8xi32>
    %17 = arith.cmpi eq, %10, %16 : vector<8x8xi32>
    %c7_i32_7 = arith.constant 7 : i32
    %18 = tpu.dynamic_rotate %9 by %c7_i32_7 dim 0 : vector<8x8xf32>, i32 -> vector<8x8xf32>
    %cst_8 = arith.constant 0.000000e+00 : f32
    %19 = vector.broadcast %cst_8 : f32 to vector<8x8xf32>
    %20 = arith.select %17, %19, %18 : vector<8x8xi1>, vector<8x8xf32>
    %21 = tpu.concatenate %15, %9, %20 in 1 : vector<8x8xf32>, vector<8x8xf32>, vector<8x8xf32> -> vector<8x24xf32>
    %c0_9 = arith.constant 0 : index
    %c0_10 = arith.constant 0 : index
    %22 = vector.load %arg4[%c0_9, %c0_10] : memref<24x8xf32, #tpu.memory_space<vmem>>, vector<24x8xf32>
    %cst_11 = arith.constant dense<0.000000e+00> : vector<8x8xf32>
    %23 = tpu.matmul %21, %22, %cst_11 {dimension_numbers = #tpu.dot_dimension_numbers<[1], [0], [0], [1], [0, 0, 1, 1], [], []>} : vector<8x24xf32>, vector<24x8xf32>, vector<8x8xf32> -> vector<8x8xf32>
    %c0_12 = arith.constant 0 : index
    %c0_13 = arith.constant 0 : index
    %c0_14 = arith.constant 0 : index
    %24 = vector.load %arg5[%c0_12, %c0_13, %c0_14] : memref<1x8x8xf32, #tpu.memory_space<vmem>>, vector<1x8x8xf32>
    %25 = vector.shape_cast %24 : vector<1x8x8xf32> to vector<8x8xf32>
    %26 = vector.shape_cast %23 : vector<8x8xf32> to vector<1x8x8xf32>
    tpu.vector_store %arg5[%c0_12, %c0_13, %c0_14], %26 {strides = array<i32>} : memref<1x8x8xf32, #tpu.memory_space<vmem>>, vector<1x8x8xf32>,
    %cst_15 = arith.constant dense<0.000000e+00> : vector<8xf32>
    %27 = vector.multi_reduction <add>, %23, %cst_15 [0] : vector<8x8xf32> to vector<8xf32>
    %28 = vector.shape_cast %27 : vector<8xf32> to vector<1x8xf32>
    %29 = arith.mulf %23, %23 : vector<8x8xf32>
    %cst_16 = arith.constant dense<0.000000e+00> : vector<8xf32>
    %30 = vector.multi_reduction <add>, %29, %cst_16 [0] : vector<8x8xf32> to vector<8xf32>
    %31 = vector.shape_cast %30 : vector<8xf32> to vector<1x8xf32>
    %32 = tpu.concatenate %28, %31 in 0 : vector<1x8xf32>, vector<1x8xf32> -> vector<2x8xf32>
    %c0_17 = arith.constant 0 : index
    %c0_18 = arith.constant 0 : index
    %c0_19 = arith.constant 0 : index
    %33 = vector.load %arg6[%c0_17, %c0_18, %c0_19] : memref<1x2x8xf32, #tpu.memory_space<vmem>>, vector<1x2x8xf32>
    %34 = vector.shape_cast %33 : vector<1x2x8xf32> to vector<2x8xf32>
    %35 = vector.shape_cast %32 : vector<2x8xf32> to vector<1x2x8xf32>
    tpu.vector_store %arg6[%c0_17, %c0_18, %c0_19], %35 {strides = array<i32>} : memref<1x2x8xf32, #tpu.memory_space<vmem>>, vector<1x2x8xf32>,
    return
  }
  func.func @transform_0(%arg0: i32) -> (i32, i32, i32) {
    %c0_i32 = arith.constant 0 : i32
    %c0_i32_0 = arith.constant 0 : i32
    %c0_i32_1 = arith.constant 0 : i32
    return %arg0, %c0_i32, %c0_i32_0 : i32, i32, i32
  }
  func.func @transform_1(%arg0: i32) -> (i32, i32) {
    %c0_i32 = arith.constant 0 : i32
    %c0_i32_0 = arith.constant 0 : i32
    %c0_i32_1 = arith.constant 0 : i32
    return %c0_i32, %c0_i32_0 : i32, i32
  }
  func.func @transform_2(%arg0: i32) -> (i32, i32) {
    %c0_i32 = arith.constant 0 : i32
    %c0_i32_0 = arith.constant 0 : i32
    %c0_i32_1 = arith.constant 0 : i32
    return %c0_i32, %c0_i32_0 : i32, i32
  }
  func.func @transform_3(%arg0: i32) -> (i32, i32) {
    %c0_i32 = arith.constant 0 : i32
    %c0_i32_0 = arith.constant 0 : i32
    %c0_i32_1 = arith.constant 0 : i32
    return %c0_i32, %c0_i32_0 : i32, i32
  }
  func.func @transform_4(%arg0: i32) -> (i32, i32, i32) {
    %c0_i32 = arith.constant 0 : i32
    %c0_i32_0 = arith.constant 0 : i32
    %c0_i32_1 = arith.constant 0 : i32
    return %arg0, %c0_i32, %c0_i32_0 : i32, i32, i32
  }
  func.func @transform_5(%arg0: i32) -> (i32, i32, i32) {
    %c0_i32 = arith.constant 0 : i32
    %c0_i32_0 = arith.constant 0 : i32
    %c0_i32_1 = arith.constant 0 : i32
    return %arg0, %c0_i32, %c0_i32_0 : i32, i32, i32
  }
}

</mosaic_0001>

<bundles_post_ra>
// kernel: down_forward.3
= control target key start
LH: loop header
LB: loop body
LE: loop exit
PB: predicated region body
PF: predicated region fallthrough
CT: control target
= control target key end

     0   :  { %s463_s12 = smov 0   ;;  %s497_s0 = inlined_call_operand.vmem [shape: f32[2,8,8], index: 0, kind: input, shape index: {}]   ;;  %s498_s1 = inlined_call_operand.vmem [shape: f32[12,8], index: 1, kind: input, shape index: {}]   ;;  %s499_s2 = inlined_call_operand.vmem [shape: f32[2,8,8], index: 2, kind: output, shape index: {0}]   ;;  %s500_s3 = inlined_call_operand.vmem [shape: f32[2,2,8], index: 3, kind: output, shape index: {1}]  }
   0x1 LB: > { %s387_s13 = sadd.s32 4294967295, %s434_s12   ;;  %p391_p0 = scmp.ge.s32.totalorder %s434_s12, 1  ;;  %s434_s12 = sphi %s463_s12, %s14_s12  }
   0x2   : > { %p139_p1 = scmp.lt.s32.totalorder %s434_s12, 3 }
   0x4   : > { %p140_p2 = pnand %p391_p0, %p139_p1 }
   0x5   : > { %p165_p3 = scmp.lt.s32.totalorder (!%p140_p2), %s387_s13, 1  ;;  %s436_s18 = smov (!%p140_p2), 124   ;;  %v203_v1 = vld [vmem:[%s498_s1] sm:$0xff] (!%p140_p2)  ;;  %v204_v2 = vld [vmem:[%s498_s1 + $0x8] sm:$0xf] (!%p140_p2)  ;;  %vm209_vm0 = vcmask (!%p140_p2), 1043456   ;;  %v183_v6 = vlaneseq (!%p140_p2) }
   0x6   : > { %143 = sbr.rel (%p140_p2) target bundleno = 482 (0x1e2), region = 28  ;;  %v410_v3 = vpack.c.bf16 (!%p140_p2), %v204_v2, %v203_v1  ;;  %v437_v4 = vmov (!%p140_p2), 0.0|0.0   ;;  %vm438_vm1 = vmmov (!%p140_p2), 1   ;;  %vm439_vm3 = vmmov (!%p140_p2), 0   ;;  %s441_s23 = smov (!%p140_p2), 4  }
   0x7   : > { %409 = vmatprep.subr.bf16.mxu0 (!%p140_p2), %v437_v4  ;;  %vm411_vm2 = vmpackc.low (!%p140_p2), %vm209_vm0, %vm438_vm1  ;;  %v440_v5 = vmov (!%p140_p2), 0.0   ;;  %v184_v7 = vshrl.u32 (!%p140_p2), %v183_v6, 7  ;;  %s442_s24 = smov (!%p140_p2), 8   ;;  %vm199_vm6 = vcmask (!%p140_p2), 31744   ;;  %vm201_vm7 = vcmask (!%p140_p2), 64512  }
   0x8   : > { %412 = vmatpush3.bf16.msk.msra.mxu0 (!%p140_p2), %vm411_vm2, %v410_v3  ;;  %406 = vmatprep.mubr.msk.f32.mxu0 (!%p140_p2), %vm439_vm3, %v440_v5  ;;  %vm205_vm8 = vcmask (!%p140_p2), 97280   ;;  %vm299_vm9 = vcmask (!%p140_p2), 1040384   ;;  %vm301_vm10 = vcmask (!%p140_p2), 58368  }
   0x9   : > { %vm188_vm4 = vcmp.eq.s32.totalorder (!%p140_p2), %v184_v7, 7  ;;  %vm185_vm5 = vcmp.eq.s32.totalorder (!%p140_p2), %v184_v7, 0 }
   0xd   : > { %s502_s13 = smov (!%p165_p3, %s387_s13), 1 }
   0xe   : > { %s392_s14 = sshll.u32 %s502_s13, 3  ;;  %s394_s28 = sshll.u32 %s502_s13, 1 }
   0xf   : > { %s168_s17 = scalar_lea.vmem %s497_s0, %s392_s14  ;;  %s172_s27 = scalar_lea.vmem %s499_s2, %s392_s14 }
  0x10   : > { %v177_v0 = vld [vmem:[%s168_s17] sm:$0xff]  ;;  %s176_s4 = scalar_lea.vmem %s500_s3, %s394_s28 }
  0x11   : > { %179 = vrot.lane.b32.xlu0 %v177_v0, %s436_s18 }
  0x83   : > { %v180_v8 = vpop.permute.xlu0 %179 }
  0x84   : > { %v182_v9 = vmax.f32 %v177_v0, %v180_v8 }
  0x86   : > { %v186_v10 = vrot.slane %v182_v9, 7  ;;  %192 = vrot.lane.b32.xlu0 %v182_v9, %s441_s23  ;;  %v189_v11 = vrot.slane %v182_v9, 1 }
  0x88   : > { %v190_v12 = vsel %vm188_vm4, 0.0, %v189_v11  ;;  %v187_v13 = vsel %vm185_vm5, 0.0, %v186_v10 }
  0x89   : > { %196 = vrot.lane.b32.xlu1 %v190_v12, %s442_s24 }
  0xf8   : > { %v193_v14 = vpop.permute.xlu0 %192 }
  0xf9   : > { %v200_v15 = vsel %vm199_vm6, %v187_v13, %v193_v14 }
  0xfb   : > { %v197_v16 = vpop.permute.xlu1 %196 }
  0xfc   : > { %v202_v17 = vsel %vm201_vm7, %v200_v15, %v197_v16 }
  0xfd   : > { %407 = vmatmul.mubr.msk.f32.vlgmr.msra.gmra.mrb[0].mxu0 %vm205_vm8, %v202_v17 }
 0x1d0   : > { %v279_v18 = vpop.f32.mrb[0].mxu0 }
 0x1d1   : > { %283 = vst.msk [vmem:[%s172_s27] sm:$0xff] %vm201_vm7, %v279_v18  ;;  %v284_v19 = vsel %vm201_vm7, %v279_v18, 0.0  ;;  %v291_v20 = vmul.f32 %v279_v18, %v279_v18  ;;  %v408_v21 = vpop.f32.mrb[1].mxu0 }
 0x1d2   : > { %v285_v22 = vrot.slane %v284_v19, 4 }
 0x1d3   : > { %v292_v23 = vsel %vm201_vm7, %v291_v20, 0.0 }
 0x1d4   : > { %v286_v24 = vadd.f32 %v285_v22, %v284_v19  ;;  %v293_v25 = vrot.slane %v292_v23, 4 }
 0x1d6   : > { %v287_v26 = vrot.slane %v286_v24, 2  ;;  %v294_v27 = vadd.f32 %v293_v25, %v292_v23 }
 0x1d8   : > { %v288_v28 = vadd.f32 %v287_v26, %v286_v24  ;;  %v295_v29 = vrot.slane %v294_v27, 2 }
 0x1da   : > { %v289_v30 = vrot.slane %v288_v28, 1  ;;  %v296_v31 = vadd.f32 %v295_v29, %v294_v27 }
 0x1dc   : > { %v297_v32 = vrot.slane %v296_v31, 1  ;;  %v290_v33 = vadd.f32 %v289_v30, %v288_v28 }
 0x1de   : > { %v298_v34 = vadd.f32 %v297_v32, %v296_v31 }
 0x1e0   : > { %v300_v35 = vsel %vm299_vm9, %v290_v33, %v298_v34 }
 0x1e1   : > { %302 = vst.msk [vmem:[%s176_s4] sm:$0x3] %vm301_vm10, %v300_v35 }
 0x1e2 PF: > { %s14_s12 = sadd.s32 1, %s434_s12  }
 0x1e3   : > { %p11_p4 = scmp.ge.s32.totalorder %s14_s12, 4  }
 0x1e5   :  { %13 = sbr.rel (!%p11_p4) target bundleno = 1 (0x1), region = 70 }

// kernel: down_forward.5
= control target key start
LH: loop header
LB: loop body
LE: loop exit
PB: predicated region body
PF: predicated region fallthrough
CT: control target
= control target key end

     0   :  { %8 = vsyncpa [#allocation3], 0  ;;  %s534_s0 = inlined_call_operand.vmem [shape: f32[2,8,8], index: 0, kind: input, shape index: {}]   ;;  %s535_s1 = inlined_call_operand.vmem [shape: f32[1,8], index: 1, kind: input, shape index: {}]   ;;  %s536_s2 = inlined_call_operand.vmem [shape: f32[1,8], index: 2, kind: input, shape index: {}]   ;;  %s537_s3 = inlined_call_operand.hbm [shape: f32[2,8,8], index: 3, kind: output, shape index: {}]  }
   0x1   :  { %10 = vsyncpa [#allocation3 + $0x1], 0  ;;  %s428_s12 = smov 0   ;;  %s430_s13 = smov 0  }
   0x2   :  { %s432_s14 = smov 0   ;;  %s434_s15 = smov 0  }
   0x3 LB: > { %s449_s16 = sadd.s32 4294967295, %s405_s15   ;;  %s291_s17 = sadd.s32 4294967294, %s405_s15   ;;  %s405_s15 = sphi %s434_s15, %s543_s15   ;;  %s401_s14 = sphi %s432_s14, %s542_s14   ;;  %s397_s13 = sphi %s430_s13, %s541_s13   ;;  %s393_s12 = sphi %s428_s12, %s540_s12  }
   0x4   : > { %s453_s18 = sadd.s32 1, %s405_s15   ;;  %s91_s19 = sadd.s32 1, %s401_s14 }
   0x5   : > { %s88_s20 = ssub.s32 %s405_s15, %s453_s18  ;;  %p101_p0 = scmp.ne.s32.totalorder %s401_s14, %s397_s13 }
   0x6   : > { %p89_p1 = scmp.eq.s32.totalorder %s88_s20, 0  ;;  %p102_p2 = scmp.eq.s32.totalorder %s449_s16, 1 }
   0x7   : > { %p107_p3 = scmp.ne.s32.totalorder %s397_s13, %s393_s12  ;;  %p108_p4 = scmp.eq.s32.totalorder %s291_s17, 1 }
   0x8   : > { %s464_s21 = scalar_select %p89_p1, %s401_s14, %s91_s19  }
   0x9   : > { %p466_p5 = por %p102_p2, %p101_p0  ;;  %p470_p6 = por %p108_p4, %p107_p3 }
   0xa   : > { %p294_p7 = scmp.ge.s32.totalorder %s405_s15, 1  ;;  %p139_p8 = scmp.lt.s32.totalorder %s405_s15, 3 }
   0xc   : > { %p140_p9 = pnand %p294_p7, %p139_p8 }
   0xd   : > { %p162_p10 = scmp.lt.s32.totalorder (!%p140_p9), %s449_s16, 1  ;;  %v297_v0 = vld [vmem:[%s535_s1] ss:$0 sm:$0xff] (!%p140_p9)  ;;  %s159_s6 = sand.u32 (!%p140_p9), 1, %s397_s13   ;;  %vm216_vm0 = vcmask (!%p140_p9), 64512  }
   0xe   : > { %143 = sbr.rel (%p140_p9) target bundleno = 175 (0xaf), region = 32  ;;  %v298_v2 = vld [vmem:[%s536_s2] ss:$0 sm:$0xff] (!%p140_p9)  ;;  %s295_s7 = sshll.u32 (!%p140_p9), %s159_s6, 3 }
   0xf   : > { %s300_s8 = sshll.u32 (!%p140_p9), %s449_s16, 7  ;;  %s161_s9 = scalar_lea.vmem (!%p140_p9), [#allocation2], %s295_s7 }
  0x10   : > { %s232_s10 = sshll.u32 (!%p140_p9), %s161_s9, 4  ;;  %s492_s19 = scalar_lea.hbm (!%p140_p9), %s537_s3, %s300_s8  ;;  %s494_s10 = int_to_ptr.vmem [resolvable:$true] %s232_s10 }
  0x11   : > { %s219_s20 = scalar_lea.sflag (!%p140_p9), [#allocation3], %s159_s6 }
  0x15   : > { %s163_s24 = scalar_select %p162_p10, %s449_s16, 1 }
  0x16   : > { %s407_s16 = smov [#allocation2]  }
  0x17   : > { %s296_s25 = sshll.u32 %s163_s24, 3  ;;  %s343_s24 = scalar_lea.vmem %s494_s10, 128 }
  0x18   : > { %s165_s30 = scalar_lea.vmem %s534_s0, %s296_s25  ;;  %p344_p11 = scmp.ne.s32.totalorder %s494_s10, %s343_s24 }
  0x19   : > { %v166_v1 = vld [vmem:[%s165_s30] sm:$0xff]  ;;  %s347_s25 = sshll.u32 %s407_s16, 4  ;;  %s348_s25 = int_to_ptr.vmem [resolvable:$false] %s347_s25 }
  0x1a   : > { %v174_v3 = vmul.f32 %v297_v0, %v166_v1  ;;  %p345_p12 = pnand %p344_p11, %p466_p5  ;;  %s349_s26 = scalar_lea.vmem %s348_s25, 256 }
  0x1b   : > { %p350_p0 = scmp.lt.s32.totalorder %s494_s10, %s348_s25  ;;  %p351_p1 = scmp.lt.s32.totalorder %s349_s26, %s343_s24 }
  0x1c   : > { %v182_v4 = vadd.f32 %v298_v2, %v174_v3  ;;  %p346_p13 = pneg %p345_p12 }
  0x1d   : > { %p352_p2 = por %p351_p1, %p350_p0 }
  0x1e   : > { %v183_v5 = vmax.f32 %v182_v4, 0.0 }
  0x1f   : > { %p353_p3 = pnand %p352_p2, %p346_p13 }
  0x20   : > { %184 = vxpose.xlu0.b32.start.end [1/1] (short) (narrow) %v183_v5, 8 }
  0xa0   : > { %v200_v6 = vpop.trf.xlu0 }
  0xa1   : > { %217 = vst.msk [vmem:[%s161_s9] sm:$0xff] %vm216_vm0, %v200_v6 }
  0xa2   : > { %356 = shalt.err (!%p353_p3)
}
  0xa3   : > { %s357_s27 = scalar_lea.hbm %s492_s19, 128  ;;  %s361_s30 = scalar_lea.hbm %s537_s3, 256 }
  0xa4   : > { %p358_p4 = scmp.ne.s32.totalorder %s492_s19, %s357_s27  ;;  %p362_p9 = scmp.lt.u32.totalorder %s492_s19, %s537_s3 }
  0xa5   : > { %p363_p10 = scmp.lt.u32.totalorder %s361_s30, %s357_s27  ;;  %p365_p12 = scmp.lt.u32.totalorder %s357_s27, %s492_s19 }
  0xa6   : > { %p359_p7 = pnand %p358_p4, %p466_p5 }
  0xa7   : > { %p364_p11 = por %p363_p10, %p362_p9 }
  0xa8   : > { %p360_p8 = pneg %p359_p7 }
  0xa9   : > { %p366_p13 = por %p365_p12, %p364_p11 }
  0xab   : > { %p367_p0 = pnand %p366_p13, %p360_p8 }
  0xad   : > { %370 = shalt.err (!%p367_p0)
}
  0xae   : > { %303 = dma.vmem_to_hbm [thread:$0]  (%p466_p5), %s494_s10, 128, %s492_s19, %s219_s20  }
  0xaf PF: > { %p309_p1 = scmp.ge.s32.totalorder %s405_s15, 2  ;;  %s244_s6 = sand.u32 1, %s393_s12  }
  0xb0   : > { %s245_s7 = scalar_lea.sflag [#allocation3], %s244_s6 }
  0xb1   : > { %p306_p2 = pnand %p309_p1, %p470_p6 }
  0xb3   : > { %388 = dma.done.wait (!%p306_p2), %s245_s7, 128  }
  0xb4   : > { %390 = vsyncadd (!%p306_p2), %s245_s7, 4294967168  ;;  %p13_p3 = scmp.ge.s32.totalorder %s453_s18, 4   ;;  %s540_s12 = smov %s397_s13 }
  0xb5   : > { %s541_s13 = smov %s401_s14  ;;  %s542_s14 = smov %s464_s21 }
  0xb6   : > { %s543_s15 = smov %s453_s18  ;;  %15 = sbr.rel (!%p13_p3) target bundleno = 3 (0x3), region = 67 }
  0xbd   :  { %250 = vsyncpa [#allocation3], 1 }
  0xbe   :  { %252 = vsyncpa [#allocation3 + $0x1], 1 }

// kernel: down_forward.4
= control target key start
LH: loop header
LB: loop body
LE: loop exit
PB: predicated region body
PF: predicated region fallthrough
CT: control target
= control target key end

     0   :  { %s535_s18 = smov 0   ;;  %s578_s0 = inlined_call_operand.vmem [shape: f32[2,8,8], index: 0, kind: input, shape index: {}]   ;;  %s579_s1 = inlined_call_operand.vmem [shape: f32[1,8], index: 1, kind: input, shape index: {}]   ;;  %s580_s2 = inlined_call_operand.vmem [shape: f32[1,8], index: 2, kind: input, shape index: {}]   ;;  %s581_s3 = inlined_call_operand.vmem [shape: f32[24,8], index: 3, kind: input, shape index: {}]   ;;  %s582_s4 = inlined_call_operand.vmem [shape: f32[2,8,8], index: 4, kind: output, shape index: {0}]   ;;  %s583_s5 = inlined_call_operand.vmem [shape: f32[2,2,8], index: 5, kind: output, shape index: {1}]  }
   0x1 LB: > { %s450_s19 = sadd.s32 4294967295, %s498_s18   ;;  %p454_p0 = scmp.ge.s32.totalorder %s498_s18, 1  ;;  %s498_s18 = sphi %s535_s18, %s16_s18  }
   0x2   : > { %p189_p1 = scmp.lt.s32.totalorder %s498_s18, 3 }
   0x4   : > { %p190_p2 = pnand %p454_p0, %p189_p1 }
   0x5   : > { %p219_p3 = scmp.lt.s32.totalorder (!%p190_p2), %s450_s19, 1  ;;  %v269_v0 = vld [vmem:[%s581_s3] sm:$0xff] (!%p190_p2)  ;;  %v270_v1 = vld [vmem:[%s581_s3 + $0x8] sm:$0xff] (!%p190_p2)  ;;  %v500_v2 = vmov (!%p190_p2), 0.0|0.0   ;;  %v249_v5 = vlaneseq (!%p190_p2)  ;;  %vm501_vm0 = vmmov (!%p190_p2), 0   ;;  %v502_v6 = vmov (!%p190_p2), 0.0  }
   0x6   : > { %193 = sbr.rel (%p190_p2) target bundleno = 372 (0x174), region = 36  ;;  %476 = vmatprep.subr.bf16.mxu0 (!%p190_p2), %v500_v2  ;;  %v477_v3 = vpack.c.bf16 (!%p190_p2), %v270_v1, %v269_v0  ;;  %v458_v4 = vld [vmem:[%s579_s1] ss:$0 sm:$0xff] (!%p190_p2)  ;;  %473 = vmatprep.mubr.msk.f32.mxu0 (!%p190_p2), %vm501_vm0, %v502_v6  ;;  %v271_v7 = vld [vmem:[%s581_s3 + $0x10] sm:$0xff] (!%p190_p2)  ;;  %s503_s9 = smov (!%p190_p2), 8   ;;  %vm265_vm3 = vcmask (!%p190_p2), 64512  }
   0x7   : > { %v459_v9 = vld [vmem:[%s580_s2] ss:$0 sm:$0xff] (!%p190_p2)  ;;  %v250_v11 = vshrl.u32 (!%p190_p2), %v249_v5, 7  ;;  %s504_s10 = smov (!%p190_p2), 16   ;;  %vm267_vm4 = vcmask (!%p190_p2), 130048   ;;  %vm272_vm5 = vcmask (!%p190_p2), 195584  }
   0x8   : > { %478 = vmatpush3.bf16.msra.mxu0 (!%p190_p2), %v477_v3  ;;  %vm362_vm6 = vcmask (!%p190_p2), 1040384   ;;  %vm364_vm7 = vcmask (!%p190_p2), 58368  }
   0x9   : > { %471 = vmatprep.subr.mxu0 (!%p190_p2), %v502_v6  ;;  %vm254_vm1 = vcmp.eq.s32.totalorder (!%p190_p2), %v250_v11, 7  ;;  %vm251_vm2 = vcmp.eq.s32.totalorder (!%p190_p2), %v250_v11, 0 }
   0xc   : > { %472 = vmatpush3.msra.mxu0 (!%p190_p2), %v271_v7 }
   0xd   : > { %s585_s19 = smov (!%p219_p3, %s450_s19), 1 }
   0xe   : > { %s455_s24 = sshll.u32 %s585_s19, 3  ;;  %s457_s14 = sshll.u32 %s585_s19, 1 }
   0xf   : > { %s222_s29 = scalar_lea.vmem %s578_s0, %s455_s24  ;;  %s226_s13 = scalar_lea.vmem %s582_s4, %s455_s24 }
  0x10   : > { %v231_v8 = vld [vmem:[%s222_s29] sm:$0xff]  ;;  %s230_s17 = scalar_lea.vmem %s583_s5, %s457_s14 }
  0x11   : > { %v239_v10 = vmul.f32 %v458_v4, %v231_v8 }
  0x13   : > { %v247_v12 = vadd.f32 %v459_v9, %v239_v10 }
  0x15   : > { %v248_v13 = vmax.f32 %v247_v12, 0.0 }
  0x17   : > { %258 = vrot.lane.b32.xlu0 %v248_v13, %s503_s9  ;;  %v255_v14 = vrot.slane %v248_v13, 1  ;;  %v252_v15 = vrot.slane %v248_v13, 7 }
  0x19   : > { %v256_v16 = vsel %vm254_vm1, 0.0, %v255_v14  ;;  %v253_v17 = vsel %vm251_vm2, 0.0, %v252_v15 }
  0x1b   : > { %262 = vrot.lane.b32.xlu0 %v256_v16, %s504_s10 }
  0x89   : > { %v259_v18 = vpop.permute.xlu0 %258 }
  0x8a   : > { %v266_v19 = vsel %vm265_vm3, %v253_v17, %v259_v18 }
  0x8d   : > { %v263_v20 = vpop.permute.xlu0 %262 }
  0x8e   : > { %v268_v21 = vsel %vm267_vm4, %v266_v19, %v263_v20 }
  0x8f   : > { %474 = vmatmul.mubr.msk.f32.vlgmr.msra.gmra.mrb[0].mxu0 %vm272_vm5, %v268_v21 }
 0x162   : > { %v342_v22 = vpop.f32.mrb[0].mxu0 }
 0x163   : > { %346 = vst.msk [vmem:[%s226_s13] sm:$0xff] %vm265_vm3, %v342_v22  ;;  %v347_v23 = vsel %vm265_vm3, %v342_v22, 0.0  ;;  %v354_v24 = vmul.f32 %v342_v22, %v342_v22  ;;  %v475_v25 = vpop.f32.mrb[1].mxu0 }
 0x164   : > { %v348_v26 = vrot.slane %v347_v23, 4 }
 0x165   : > { %v355_v27 = vsel %vm265_vm3, %v354_v24, 0.0 }
 0x166   : > { %v349_v28 = vadd.f32 %v348_v26, %v347_v23  ;;  %v356_v29 = vrot.slane %v355_v27, 4 }
 0x168   : > { %v350_v30 = vrot.slane %v349_v28, 2  ;;  %v357_v31 = vadd.f32 %v356_v29, %v355_v27 }
 0x16a   : > { %v351_v32 = vadd.f32 %v350_v30, %v349_v28  ;;  %v358_v33 = vrot.slane %v357_v31, 2 }
 0x16c   : > { %v352_v34 = vrot.slane %v351_v32, 1  ;;  %v359_v35 = vadd.f32 %v358_v33, %v357_v31 }
 0x16e   : > { %v360_v36 = vrot.slane %v359_v35, 1  ;;  %v353_v37 = vadd.f32 %v352_v34, %v351_v32 }
 0x170   : > { %v361_v38 = vadd.f32 %v360_v36, %v359_v35 }
 0x172   : > { %v363_v39 = vsel %vm362_vm6, %v353_v37, %v361_v38 }
 0x173   : > { %365 = vst.msk [vmem:[%s230_s17] sm:$0x3] %vm364_vm7, %v363_v39 }
 0x174 PF: > { %s16_s18 = sadd.s32 1, %s498_s18  }
 0x175   : > { %p13_p4 = scmp.ge.s32.totalorder %s16_s18, 4  }
 0x177   :  { %15 = sbr.rel (!%p13_p4) target bundleno = 1 (0x1), region = 78 }

</bundles_post_ra>
